<compile_context>
chip_gen: v7x
topology: tpu7x:2x2x1
jax: 0.10.0
libtpu: 0.0.40
codegen_flags: <defaults>
</compile_context>

<pallas_src>
import jax
import jax.numpy as jnp
from jax.experimental import pallas as pl
from jax.experimental.pallas import tpu as pltpu


_TM_DEFAULT = 512  # rows per tile: multiple of 8 and 128, VMEM-safe on v5e/v6e/v7x


def _calibration_linear_kernel(x_ref, w_ref, b_ref, o_ref):
    # x_ref: (TM, H)  streamed input rows
    # w_ref: (2, H)   weight in PyTorch Linear layout (resident across grid)
    # b_ref: (2, 1)   bias, f32 (resident)
    # o_ref: (2, TM)  lane-dense transposed output tile
    yT = jax.lax.dot_general(
        w_ref[...], x_ref[...],
        dimension_numbers=(((1,), (1,)), ((), ())),  # contract H with H -> (2, TM)
        preferred_element_type=jnp.float32,
    )
    o_ref[...] = (yT + b_ref[...]).astype(o_ref.dtype)


def calibration_linear(hidden_states, weight, bias, *, tm=_TM_DEFAULT):
    """y = hidden_states @ weight.T + bias  (PyTorch nn.Linear forward semantics).

    hidden_states: (..., H)  (f32 or bf16 -- dtype is preserved)
    weight:        (2, H)    PyTorch Linear layout (not pre-transposed)
    bias:          (2,)
    returns:       (..., 2)  in hidden_states.dtype
    """
    *lead, H = hidden_states.shape
    M = 1
    for d in lead:
        M *= d

    x2d = hidden_states.reshape(M, H)                # keep input dtype (bf16 stays bf16)
    w = weight.astype(x2d.dtype)                     # (2, H)
    b_col = bias.astype(jnp.float32).reshape(2, 1)   # (2, 1), bias add in f32

    if M <= tm:
        tm = M  # single full block; block == full array so any M is a legal shape
    grid = (pl.cdiv(M, tm),)

    out_t = pl.pallas_call(
        _calibration_linear_kernel,
        out_shape=jax.ShapeDtypeStruct((2, M), x2d.dtype),
        grid=grid,
        in_specs=[
            pl.BlockSpec((tm, H), lambda i: (i, 0)),   # stream x row-tiles
            pl.BlockSpec((2, H), lambda i: (0, 0)),    # weight resident
            pl.BlockSpec((2, 1), lambda i: (0, 0)),    # bias resident
        ],
        out_specs=pl.BlockSpec((2, tm), lambda i: (0, i)),  # lane-dense writeback
        compiler_params=pltpu.CompilerParams(
            dimension_semantics=("parallel",),
        ),
    )(x2d, w, b_col)

    out2d = out_t.T  # (M, 2)
    return out2d.reshape(*lead, 2)


if __name__ == "__main__":
    # TODO(synk): the module's save()/load() (torch file I/O) has no Pallas
    # equivalent and is intentionally not implemented.
    hidden_size = 32
    batch, seq = 2, 8

    key = jax.random.PRNGKey(0)
    k_x, k_b, k_x2, k_w2 = jax.random.split(key, 4)

    # Parameter init mirroring the module's __init__:
    #   weight.data.fill_(0); bias keeps PyTorch's default U(-1/sqrt(H), 1/sqrt(H)).
    weight = jnp.zeros((2, hidden_size), dtype=jnp.float32)
    bound = 1.0 / (hidden_size ** 0.5)
    bias = jax.random.uniform(k_b, (2,), jnp.float32, minval=-bound, maxval=bound)

    hidden_states = jax.random.normal(k_x, (batch, seq, hidden_size), jnp.float32)

    out = calibration_linear(hidden_states, weight, bias)
    out = jax.block_until_ready(out)

    ref = hidden_states @ weight.T + bias
    assert out.shape == (batch, seq, 2)
    assert jnp.allclose(out, ref, atol=1e-4, rtol=1e-4), "mismatch vs reference (small)"

    # Second check: nonzero weights and M > TM (exercises the tiled grid path,
    # including a partial last block since 1280 is not a multiple of 512).
    batch2, seq2 = 4, 320
    hs2 = jax.random.normal(k_x2, (batch2, seq2, hidden_size), jnp.float32)
    w2 = jax.random.normal(k_w2, (2, hidden_size), jnp.float32) * 0.1
    out2 = jax.block_until_ready(calibration_linear(hs2, w2, bias))
    ref2 = hs2 @ w2.T + bias
    assert out2.shape == (batch2, seq2, 2)
    assert jnp.allclose(out2, ref2, atol=1e-4, rtol=1e-4), "mismatch vs reference (tiled)"

    print("KERNEL_OK")
</pallas_src>

<mosaic_0001>
module attributes {stable_mosaic.version = 11 : i64} {
  func.func @_calibration_linear_kernel(%arg0: i32, %arg1: memref<16x32xf32, #tpu.memory_space<vmem>>, %arg2: memref<2x32xf32, #tpu.memory_space<vmem>>, %arg3: memref<2x1xf32, #tpu.memory_space<vmem>>, %arg4: memref<2x16xf32, #tpu.memory_space<vmem>>) attributes {dimension_semantics = [#tpu.dimension_semantics<parallel>], iteration_bounds = array<i64: 1>, scalar_prefetch = 0 : i64, scratch_operands = 0 : i64, tpu.core_type = #tpu.core_type<tc>, window_params = [{transform_indices = @transform_0, window_bounds = array<i64: 16, 32>}, {pipeline_mode = #tpu.pipeline_mode<synchronous>, transform_indices = @transform_1, window_bounds = array<i64: 2, 32>}, {pipeline_mode = #tpu.pipeline_mode<synchronous>, transform_indices = @transform_2, window_bounds = array<i64: 2, 1>}, {transform_indices = @transform_3, window_bounds = array<i64: 2, 16>}]} {
    %c0 = arith.constant 0 : index
    %c0_0 = arith.constant 0 : index
    %0 = vector.load %arg2[%c0, %c0_0] : memref<2x32xf32, #tpu.memory_space<vmem>>, vector<2x32xf32>
    %c0_1 = arith.constant 0 : index
    %c0_2 = arith.constant 0 : index
    %1 = vector.load %arg1[%c0_1, %c0_2] : memref<16x32xf32, #tpu.memory_space<vmem>>, vector<16x32xf32>
    %cst = arith.constant dense<0.000000e+00> : vector<2x16xf32>
    %2 = tpu.matmul %0, %1, %cst {dimension_numbers = #tpu.dot_dimension_numbers<[1], [1], [0], [0], [0, 0, 1, 0], [], []>} : vector<2x32xf32>, vector<16x32xf32>, vector<2x16xf32> -> vector<2x16xf32>
    %c0_3 = arith.constant 0 : index
    %c0_4 = arith.constant 0 : index
    %3 = vector.load %arg3[%c0_3, %c0_4] : memref<2x1xf32, #tpu.memory_space<vmem>>, vector<2x1xf32>
    %4 = vector.broadcast %3 : vector<2x1xf32> to vector<2x16xf32>
    %5 = arith.addf %2, %4 : vector<2x16xf32>
    %c0_5 = arith.constant 0 : index
    %c0_6 = arith.constant 0 : index
    %6 = vector.load %arg4[%c0_5, %c0_6] : memref<2x16xf32, #tpu.memory_space<vmem>>, vector<2x16xf32>
    tpu.vector_store %arg4[%c0_5, %c0_6], %5 {strides = array<i32>} : memref<2x16xf32, #tpu.memory_space<vmem>>, vector<2x16xf32>,
    return
  }
  func.func @transform_0(%arg0: i32) -> (i32, i32) {
    %c0_i32 = arith.constant 0 : i32
    %c0_i32_0 = arith.constant 0 : i32
    return %arg0, %c0_i32 : i32, i32
  }
  func.func @transform_1(%arg0: i32) -> (i32, i32) {
    %c0_i32 = arith.constant 0 : i32
    %c0_i32_0 = arith.constant 0 : i32
    %c0_i32_1 = arith.constant 0 : i32
    return %c0_i32, %c0_i32_0 : i32, i32
  }
  func.func @transform_2(%arg0: i32) -> (i32, i32) {
    %c0_i32 = arith.constant 0 : i32
    %c0_i32_0 = arith.constant 0 : i32
    %c0_i32_1 = arith.constant 0 : i32
    return %c0_i32, %c0_i32_0 : i32, i32
  }
  func.func @transform_3(%arg0: i32) -> (i32, i32) {
    %c0_i32 = arith.constant 0 : i32
    %c0_i32_0 = arith.constant 0 : i32
    return %c0_i32, %arg0 : i32, i32
  }
}

</mosaic_0001>

<bundles_post_ra>
// kernel: tpu_custom_call.1
= control target key start
LH: loop header
LB: loop body
LE: loop exit
PB: predicated region body
PF: predicated region fallthrough
CT: control target
= control target key end

     0   :  { %8 = vsyncpa [#allocation3], 0  ;;  %s267_s0 = inlined_call_operand.hbm [shape: f32[16,32], index: 0, kind: input, shape index: {}]   ;;  %s268_s1 = inlined_call_operand.vmem [shape: f32[2,32], index: 1, kind: input, shape index: {}]   ;;  %s269_s2 = inlined_call_operand.vmem [shape: f32[2,1], index: 2, kind: input, shape index: {}]   ;;  %s270_s3 = inlined_call_operand.hbm [shape: f32[2,16], index: 3, kind: output, shape index: {}]  }
   0x1   :  { %9 = vsyncpa [#allocation4], 0  ;;  %s209_s12 = smov [#allocation2]   ;;  %s161_s16 = scalar_lea.hbm %s267_s0, 256 }
   0x2   :  { %s15_s13 = sshll.u32 %s209_s12, 4  ;;  %p162_p0 = scmp.ne.s32.totalorder %s267_s0, %s161_s16  ;;  %s16_s13 = int_to_ptr.vmem [resolvable:$true] %s15_s13 }
   0x3   :  { %p165_p1 = scmp.lt.u32.totalorder %s161_s16, %s267_s0 }
   0x5   :  { %p167_p2 = pnand %p165_p1, %p162_p0 }
   0x7   :  { %170 = shalt.err (!%p167_p2)
}
   0x8   :  { %s171_s21 = scalar_lea.vmem %s16_s13, 256  ;;  %p176_p4 = scmp.lt.s32.totalorder %s16_s13, %s16_s13 }
   0x9   :  { %p172_p3 = scmp.ne.s32.totalorder %s16_s13, %s171_s21  ;;  %p177_p5 = scmp.lt.s32.totalorder %s171_s21, %s171_s21 }
   0xb   :  { %p178_p6 = por %p177_p5, %p176_p4 }
   0xd   :  { %p179_p7 = pnand %p178_p6, %p172_p3 }
   0xf   :  { %182 = shalt.err (!%p179_p7)
}
  0x10   :  { %s210_s22 = smov 128   ;;  %s211_s23 = smov 8  }
  0x11   :  { %21 = dma.hbm_to_vmem [thread:$0]  %s267_s0, 256, %s16_s13, [#allocation3], %s210_s22, %s210_s22, %s211_s23  }
  0x12   :  { %205 = dma.done.wait [#allocation3], 256  }
  0x13   :  { %206 = vsyncadd [#allocation3], 4294967040  ;;  %v212_v0 = vmov 0.0|0.0   ;;  %vm213_vm0 = vmmov 0   ;;  %v214_v1 = vmov 0.0   ;;  %v215_v2 = vmov 0  }
  0x14   :  { %148 = vmatprep.subr.bf16.mxu0 %v212_v0  ;;  %145 = vmatprep.mubr.msk.f32.mxu0 %vm213_vm0, %v214_v1  ;;  %vm38_vm1 = vcmask 261120   ;;  %v30_v3 = vld [vmem:[#allocation2] sm:$0xff]  ;;  %v31_v4 = vld [vmem:[#allocation2 + $0x8] sm:$0xff]  ;;  %s216_s29 = smov [#allocation5]   ;;  %vm118_vm3 = vcmask 123904  }
  0x15   :  { %160 = vset.pattern.permute.xlu0 %v215_v2  ;;  %vm150_vm2 = vmpackc.low %vm38_vm1, %vm38_vm1  ;;  %v149_v5 = vpack.c.bf16 %v31_v4, %v30_v3  ;;  %v32_v6 = vld [vmem:[%s269_s2] sm:$0x3]  ;;  %s126_s30 = sshll.u32 %s216_s29, 4  ;;  %s127_s30 = int_to_ptr.vmem [resolvable:$true] %s126_s30 }
  0x16   :  { %35 = vperm.xlu0 %160, %v32_v6   ;;  %v29_v7 = vld [vmem:[%s268_s1] sm:$0x3]  ;;  %s183_s4 = scalar_lea.vmem %s127_s30, 32  ;;  %p188_p9 = scmp.lt.s32.totalorder %s127_s30, %s127_s30 }
  0x17   :  { %151 = vmatpush3.bf16.xpose.msk.msra.mxu0 %vm150_vm2, %v149_v5  ;;  %p184_p8 = scmp.ne.s32.totalorder %s127_s30, %s183_s4  ;;  %p189_p10 = scmp.lt.s32.totalorder %s183_s4, %s183_s4 }
  0x19   :  { %p190_p11 = por %p189_p10, %p188_p9 }
  0x1b   :  { %p191_p12 = pnand %p190_p11, %p184_p8 }
  0x1e   :  { %146 = vmatmul.mubr.msk.f32.vlgmr.msra.gmra.mrb[0].mxu0 %vm38_vm1, %v29_v7 }
  0x95   :  { %v36_v8 = vpop.permute.xlu0 %35 }
  0xf1   :  { %v114_v9 = vpop.f32.mrb[0].mxu0 }
  0xf2   :  { %v115_v10 = vadd.f32 %v114_v9, %v36_v8  ;;  %v147_v11 = vpop.f32.mrb[1].mxu0 }
  0xf4   :  { %119 = vst.msk [vmem:[#allocation5] sm:$0x3] %vm118_vm3, %v115_v10 }
  0xf5   :  { %194 = shalt.err (!%p191_p12)
}
  0xf6   :  { %s195_s1 = scalar_lea.hbm %s270_s3, 32 }
  0xf7   :  { %p196_p13 = scmp.ne.s32.totalorder %s270_s3, %s195_s1  ;;  %p199_p0 = scmp.lt.u32.totalorder %s195_s1, %s270_s3 }
  0xf9   :  { %p201_p1 = pnand %p199_p0, %p196_p13 }
  0xfb   :  { %204 = shalt.err (!%p201_p1)
}
  0xfc   :  { %129 = dma.vmem_to_hbm [thread:$0]  %s127_s30, 32, %s270_s3, [#allocation4]  }
  0xfd   :  { %207 = dma.done.wait [#allocation4], 32  }
  0xfe   :  { %208 = vsyncadd [#allocation4], 4294967264 }
  0xff   :  { %133 = vsyncpa [#allocation3], 1 }
 0x100   :  { %134 = vsyncpa [#allocation4], 1 }

</bundles_post_ra>
